<compile_context>
chip_gen: v5e
topology: v5e:2x2
jax: 0.10.0
libtpu: 0.0.40
codegen_flags: <defaults>
</compile_context>

<pallas_src>
import jax
import jax.numpy as jnp
from jax.experimental import pallas as pl
from jax.experimental.pallas import tpu as pltpu  # noqa: F401  (TPU backend)


def _identity_kernel(x_ref, o_ref):
    # The output buffer aliases the input buffer (input_output_aliases={0: 0}),
    # so the data is already in place: no DMA, no VMEM, no vector work.
    # TODO(synk): an in-kernel shape print would need pl.debug_print under
    # interpret mode / --xla_tpu_enable_log_recorder; the wrapper-level print
    # is semantically equivalent here since shapes are static.
    del x_ref, o_ref


def make_shape_logger(prev_layer_name):
    """Builds a callable reproducing ShapeLogger.forward (identity + shape log)."""

    @jax.jit
    def _identity(x):
        return pl.pallas_call(
            _identity_kernel,
            out_shape=jax.ShapeDtypeStruct(x.shape, x.dtype),
            in_specs=[pl.BlockSpec(memory_space=pl.ANY)],
            out_specs=pl.BlockSpec(memory_space=pl.ANY),
            input_output_aliases={0: 0},
        )(x)

    def forward(x):
        # Side effect of the original module: log the shape (fires per call,
        # outside jit, like torch eager).
        print(f'[ShapeLogger] {prev_layer_name} out shape:', x.shape)
        return _identity(x)

    return forward


if __name__ == "__main__":
    key = jax.random.PRNGKey(0)
    # Small NCHW feature map: batch=2, channels=4, 16x16 spatial.
    x = jax.random.normal(key, (2, 4, 16, 16), dtype=jnp.float32)

    shape_logger = make_shape_logger("conv1")
    out = shape_logger(x)
    out = jax.block_until_ready(out)

    assert out.shape == x.shape, out.shape
    assert out.dtype == x.dtype
    assert jnp.array_equal(out, x), "identity mismatch"

    print("KERNEL_OK")
</pallas_src>

<mosaic_0001>
module attributes {stable_mosaic.version = 11 : i64} {
  func.func @_identity_kernel(%arg0: memref<2x4x16x16xf32, #tpu.memory_space<any>>, %arg1: memref<2x4x16x16xf32, #tpu.memory_space<any>>) attributes {dimension_semantics = [], scalar_prefetch = 0 : i64, scratch_operands = 0 : i64, tpu.core_type = #tpu.core_type<tc>} {
    return
  }
}

</mosaic_0001>

<bundles_post_ra>
// kernel: _identity.1
= control target key start
LH: loop header
LB: loop body
LE: loop exit
PB: predicated region body
PF: predicated region fallthrough
CT: control target
= control target key end

     0   :  { %s16_s0 = inlined_call_operand.hbm [shape: f32[2,4,16,16], index: 0, kind: input, shape index: {}, may-alias: {0,1}]   ;;  %s17_s1 = inlined_call_operand.hbm [shape: f32[2,4,16,16], index: 1, kind: output, shape index: {}, may-alias: {0,1}]  }

</bundles_post_ra>
